<compile_context>
chip_gen: v5e
topology: v5e:2x2
jax: 0.10.0
libtpu: 0.0.40
codegen_flags: <defaults>
</compile_context>

<pallas_src>
import functools

import jax
import jax.numpy as jnp
from jax.experimental import pallas as pl
from jax.experimental.pallas import tpu as pltpu


def _round_up(n: int, m: int) -> int:
    return ((n + m - 1) // m) * m


_TB_MAX = 512  # batch-tile cap (review: 256-512; weight is re-streamed per batch tile)


def _choose_vocab_tile(vocab: int) -> int:
    """Lane-dense vocab tile.

    Pick the largest tile (<=1024, multiple of 128) that still yields at least
    2 vocab tiles, so v7x's second TensorCore gets work along the 'parallel'
    vocab axis.  Small vocabularies use a single full-width tile (a full-array
    block dim is always legal), which needs no padding and no post-slice.
    """
    vp128 = _round_up(vocab, 128)
    for tn in (1024, 512, 256, 128):
        if vp128 >= 2 * tn:
            return tn
    return vocab


# -----------------------------------------------------------------------------
# Kernel: one fused matmul + bias add.
#   x_ref : [TB, K]   bf16
#   w_ref : [K,  TN]  bf16   (fused W1^T @ W2^T, vocab padded to a TN multiple)
#   b_ref : [1,  TN]  f32    (fused b1 @ W2^T + b2, padded)
#   o_ref : [TB, TN]  out_dtype (f32 by default; bf16 optional)
# -----------------------------------------------------------------------------
def fused_affine_kernel(x_ref, w_ref, b_ref, o_ref):
    acc = jnp.dot(x_ref[...], w_ref[...], preferred_element_type=jnp.float32)
    o_ref[...] = (acc + b_ref[...]).astype(o_ref.dtype)


def fuse_and_prepare(w1, b1, w2, b2):
    """One-time preparation OUTSIDE the per-call hot path.

    w1: [emb, in], b1: [emb], w2: [vocab, emb], b2: [vocab] (PyTorch layout).
    Linear(Linear(x)) with no nonlinearity is a single affine map:
        W_fused = W1^T @ W2^T   [in, vocab]
        b_fused = b1 @ W2^T + b2
    Returns (w_fused bf16 [in, vocab_pad], b_fused f32 [1, vocab_pad]) where
    vocab_pad is a multiple of the vocab tile chosen by _choose_vocab_tile.
    """
    vocab = w2.shape[0]
    tn = _choose_vocab_tile(vocab)
    vocab_pad = _round_up(vocab, tn)

    w_fused = jnp.dot(w1.T, w2.T)            # [in, vocab], f32
    b_fused = jnp.dot(b1, w2.T) + b2         # [vocab],     f32

    if vocab_pad != vocab:
        w_fused = jnp.pad(w_fused, ((0, 0), (0, vocab_pad - vocab)))
        b_fused = jnp.pad(b_fused, ((0, vocab_pad - vocab),))

    return (w_fused.astype(jnp.bfloat16),
            b_fused.reshape(1, vocab_pad).astype(jnp.float32))


@functools.partial(jax.jit, static_argnames=("vocab", "out_dtype"))
def pass2vec_forward(x, w_fused, b_fused, *, vocab, out_dtype=jnp.float32):
    """x: [B, input_size] f32; w_fused: [input_size, vocab_pad] bf16;
    b_fused: [1, vocab_pad] f32.  Returns [B, vocab] in out_dtype (no padding,
    no post-kernel slice)."""
    B, K = x.shape
    Kw, vocab_pad = w_fused.shape
    assert Kw == K, "w_fused K does not match x"
    tn = _choose_vocab_tile(vocab)
    assert vocab_pad % tn == 0 and vocab_pad >= vocab, (
        "w_fused/b_fused must come from fuse_and_prepare for this vocab")

    # Batch tiling: single full-dim tile up to 512 rows (always a legal block),
    # otherwise 512-row tiles with a masked trailing edge.
    tb = B if B <= _TB_MAX else _TB_MAX
    grid = (pl.cdiv(B, tb), vocab_pad // tn)

    x_bf = x.astype(jnp.bfloat16)

    out_bytes = jnp.dtype(out_dtype).itemsize
    cost = pl.CostEstimate(
        flops=2 * B * K * vocab_pad,
        transcendentals=0,
        bytes_accessed=(B * K * 2                       # x (bf16)
                        + grid[0] * K * vocab_pad * 2   # weight, re-streamed per batch tile
                        + vocab_pad * 4                 # bias
                        + B * vocab * out_bytes),       # output
    )

    return pl.pallas_call(
        fused_affine_kernel,
        out_shape=jax.ShapeDtypeStruct((B, vocab), out_dtype),
        grid_spec=pltpu.PrefetchScalarGridSpec(
            num_scalar_prefetch=0,
            grid=grid,
            in_specs=[
                pl.BlockSpec((tb, K), lambda i, j: (i, 0)),   # x batch tile
                pl.BlockSpec((K, tn), lambda i, j: (0, j)),   # fused weight tile
                pl.BlockSpec((1, tn), lambda i, j: (0, j)),   # fused bias tile
            ],
            out_specs=pl.BlockSpec((tb, tn), lambda i, j: (i, j)),
        ),
        compiler_params=pltpu.CompilerParams(
            dimension_semantics=("parallel", "parallel"),
        ),
        cost_estimate=cost,
    )(x_bf, w_fused, b_fused)


def init_params(key, embedding_dim, input_size, vocabulary_size):
    """PyTorch nn.Linear-style init: uniform(+/- 1/sqrt(fan_in))."""
    k1, k2, k3, k4 = jax.random.split(key, 4)
    bound1 = 1.0 / jnp.sqrt(input_size)
    bound2 = 1.0 / jnp.sqrt(embedding_dim)
    w1 = jax.random.uniform(k1, (embedding_dim, input_size), jnp.float32,
                            -bound1, bound1)
    b1 = jax.random.uniform(k2, (embedding_dim,), jnp.float32, -bound1, bound1)
    w2 = jax.random.uniform(k3, (vocabulary_size, embedding_dim), jnp.float32,
                            -bound2, bound2)
    b2 = jax.random.uniform(k4, (vocabulary_size,), jnp.float32, -bound2, bound2)
    return w1, b1, w2, b2


def _reference(x, w1, b1, w2, b2):
    # Pure-JAX, full-f32 reference of the original module's forward.
    return (x @ w1.T + b1) @ w2.T + b2


def _run_case(key, batch, input_size, embedding_dim, vocab):
    kx, kp = jax.random.split(key)
    x = jax.random.normal(kx, (batch, input_size), jnp.float32)
    w1, b1, w2, b2 = init_params(kp, embedding_dim, input_size, vocab)
    # One-time prep (algebraic fusion + lane padding + bf16 cast).
    w_fused, b_fused = fuse_and_prepare(w1, b1, w2, b2)
    out = jax.block_until_ready(
        pass2vec_forward(x, w_fused, b_fused, vocab=vocab))
    ref = _reference(x, w1, b1, w2, b2)
    assert out.shape == (batch, vocab), out.shape
    max_err = float(jnp.max(jnp.abs(out.astype(jnp.float32) - ref)))
    # bf16 MXU inputs => relaxed tolerance vs the f32 reference.
    assert max_err < 5e-2, f"max abs error {max_err}"


if __name__ == "__main__":
    key = jax.random.PRNGKey(0)
    k1, k2 = jax.random.split(key)

    # Required small-shape case (matches the module's toy sizes):
    # single full-array blocks, grid (1, 1), no padding anywhere.
    _run_case(k1, batch=8, input_size=32, embedding_dim=16, vocab=64)

    # Second small case exercising the tiled path: vocab=640 -> tn=256,
    # weight padded to 768, grid (1, 3) with a masked trailing vocab tile
    # (output stays exactly [16, 640] — no post-kernel slice).
    _run_case(k2, batch=16, input_size=48, embedding_dim=16, vocab=640)

    print("KERNEL_OK")
</pallas_src>

<mosaic_0001>
module attributes {stable_mosaic.version = 11 : i64} {
  func.func @fused_affine_kernel(%arg0: i32, %arg1: i32, %arg2: memref<8x32xbf16, #tpu.memory_space<vmem>>, %arg3: memref<32x64xbf16, #tpu.memory_space<vmem>>, %arg4: memref<1x64xf32, #tpu.memory_space<vmem>>, %arg5: memref<8x64xf32, #tpu.memory_space<vmem>>) attributes {dimension_semantics = [#tpu.dimension_semantics<parallel>, #tpu.dimension_semantics<parallel>], iteration_bounds = array<i64: 1, 1>, scalar_prefetch = 0 : i64, scratch_operands = 0 : i64, tpu.core_type = #tpu.core_type<tc>, window_params = [{transform_indices = @transform_0, window_bounds = array<i64: 8, 32>}, {transform_indices = @transform_1, window_bounds = array<i64: 32, 64>}, {transform_indices = @transform_2, window_bounds = array<i64: 1, 64>}, {transform_indices = @transform_3, window_bounds = array<i64: 8, 64>}]} {
    %c0 = arith.constant 0 : index
    %c0_0 = arith.constant 0 : index
    %0 = vector.load %arg2[%c0, %c0_0] : memref<8x32xbf16, #tpu.memory_space<vmem>>, vector<8x32xbf16>
    %c0_1 = arith.constant 0 : index
    %c0_2 = arith.constant 0 : index
    %1 = vector.load %arg3[%c0_1, %c0_2] : memref<32x64xbf16, #tpu.memory_space<vmem>>, vector<32x64xbf16>
    %cst = arith.constant dense<0.000000e+00> : vector<8x64xf32>
    %2 = tpu.matmul %0, %1, %cst {dimension_numbers = #tpu.dot_dimension_numbers<[1], [0], [0], [1], [0, 0, 1, 1], [], []>} : vector<8x32xbf16>, vector<32x64xbf16>, vector<8x64xf32> -> vector<8x64xf32>
    %c0_3 = arith.constant 0 : index
    %c0_4 = arith.constant 0 : index
    %3 = vector.load %arg4[%c0_3, %c0_4] : memref<1x64xf32, #tpu.memory_space<vmem>>, vector<1x64xf32>
    %4 = vector.broadcast %3 : vector<1x64xf32> to vector<8x64xf32>
    %5 = arith.addf %2, %4 : vector<8x64xf32>
    %c0_5 = arith.constant 0 : index
    %c0_6 = arith.constant 0 : index
    %6 = vector.load %arg5[%c0_5, %c0_6] : memref<8x64xf32, #tpu.memory_space<vmem>>, vector<8x64xf32>
    tpu.vector_store %arg5[%c0_5, %c0_6], %5 {strides = array<i32>} : memref<8x64xf32, #tpu.memory_space<vmem>>, vector<8x64xf32>,
    return
  }
  func.func @transform_0(%arg0: i32, %arg1: i32) -> (i32, i32) {
    %c0_i32 = arith.constant 0 : i32
    %c0_i32_0 = arith.constant 0 : i32
    return %arg0, %c0_i32 : i32, i32
  }
  func.func @transform_1(%arg0: i32, %arg1: i32) -> (i32, i32) {
    %c0_i32 = arith.constant 0 : i32
    %c0_i32_0 = arith.constant 0 : i32
    return %c0_i32, %arg1 : i32, i32
  }
  func.func @transform_2(%arg0: i32, %arg1: i32) -> (i32, i32) {
    %c0_i32 = arith.constant 0 : i32
    %c0_i32_0 = arith.constant 0 : i32
    return %c0_i32, %arg1 : i32, i32
  }
  func.func @transform_3(%arg0: i32, %arg1: i32) -> (i32, i32) {
    %c0_i32 = arith.constant 0 : i32
    return %arg0, %arg1 : i32, i32
  }
}

</mosaic_0001>

<bundles_post_ra>
// kernel: pass2vec_forward.1
= control target key start
LH: loop header
LB: loop body
LE: loop exit
PB: predicated region body
PF: predicated region fallthrough
CT: control target
= control target key end

     0   :  { %8 = vsyncpa [#allocation3], 0  ;;  %s193_s0 = inlined_call_operand.vmem [shape: bf16[8,32], index: 0, kind: input, shape index: {}]   ;;  %s194_s1 = inlined_call_operand.hbm [shape: bf16[32,64], index: 1, kind: input, shape index: {}]   ;;  %s195_s2 = inlined_call_operand.vmem [shape: f32[1,64], index: 2, kind: input, shape index: {}]   ;;  %s196_s3 = inlined_call_operand.hbm [shape: f32[8,64], index: 3, kind: output, shape index: {}]  }
   0x1   :  { %9 = vsyncpa [#allocation4], 0  ;;  %s16_s14 = sshll.u32 %s194_s1, 4  ;;  %s157_s15 = smov [#allocation2]   ;;  %s17_s14 = int_to_ptr.hbm [resolvable:$true] %s16_s14 }
   0x2   :  { %s18_s16 = sshll.u32 %s157_s15, 4  ;;  %s158_s17 = smov 64   ;;  %s19_s16 = int_to_ptr.vmem [resolvable:$true] %s18_s16 }
   0x3   :  { %s159_s18 = smov 4  }
   0x4   :  { %24 = dma.hbm_to_vmem [thread:$0]  %s17_s14, 256, %s19_s16, [#allocation3], %s158_s17, %s158_s17, %s159_s18  }
   0x5   :  { %153 = dma.done.wait [#allocation3], 256  }
   0x6   :  { %154 = vsyncadd [#allocation3], 4294967040  ;;  %v99_v0 = vld [vmem:[#allocation2 + $0x8] sm:$0xff]  ;;  %v98_v1 = vld [vmem:[#allocation2] sm:$0xff]  ;;  %vm53_vm0 = vcmask 261120   ;;  %s160_s22 = smov [#allocation5]  }
   0x7   :  { %63 = vmatpush.bf16.msra.mxu0 %v99_v0  ;;  %v32_v2 = vld [vmem:[%s193_s0] sm:$0xf]  ;;  %s77_s23 = sshll.u32 %s160_s22, 4  ;;  %s79_s26 = sshll.u32 %s196_s3, 4  ;;  %vm70_vm1 = vcmask 523264   ;;  %s78_s23 = int_to_ptr.vmem [resolvable:$true] %s77_s23  ;;  %s80_s26 = int_to_ptr.hbm [resolvable:$true] %s79_s26 }
   0x8   :  { %v104_v3 = vld [vmem:[%s195_s2] ss:$0 sm:$0xff] }
   0xb   :  { %64 = vmatpush.bf16.msra.mxu0 %v98_v1 }
   0xe   :  { %97 = vmatmul.msk.bf16.vlgmr.msra.gmra.mxu0 %vm53_vm0, %v32_v2 }
  0x8b   :  { %v66_v4 = vpop.f32.mrf.mxu0 }
  0x8c   :  { %v67_v5 = vadd.f32 %v104_v3, %v66_v4 }
  0x8e   :  { %71 = vst.msk [vmem:[#allocation5] sm:$0xff] %vm70_vm1, %v67_v5 }
  0x8f   :  { %82 = dma.vmem_to_hbm [thread:$0]  %s78_s23, 128, %s80_s26, [#allocation4]  }
  0x93   :  { %v68_v6 = vpop.f32.mrf.mxu0 }
  0x94   :  { %155 = dma.done.wait [#allocation4], 128  }
  0x95   :  { %156 = vsyncadd [#allocation4], 4294967168 }
  0x96   :  { %87 = vsyncpa [#allocation3], 1 }
  0x97   :  { %88 = vsyncpa [#allocation4], 1 }

</bundles_post_ra>
